<compile_context>
chip_gen: v7x
topology: tpu7x:2x2x1
jax: 0.10.0
libtpu: 0.0.40
codegen_flags: <defaults>
</compile_context>

<pallas_src>
import functools

import jax
import jax.numpy as jnp
from jax.experimental import pallas as pl
from jax.experimental.pallas import tpu as pltpu


# ---------------------------------------------------------------------------
# Kernel
# ---------------------------------------------------------------------------
def _actor_critic_kernel(
    x_ref,      # [bt, obs_dim]        f32
    w1_ref,     # [obs_dim, 2H]        bf16   ([aw1 | cw1])
    b1_ref,     # [1, 2H]              f32    ([ab1 | cb1])
    aw2_ref,    # [H, H]               bf16
    cw2_ref,    # [H, H]               bf16
    b2_ref,     # [1, 2H]              f32    ([ab2 | cb2])
    w3_ref,     # [2H, OUT_PAD]        bf16   block-diag(aw3, cw3), zero-padded
    b3_ref,     # [1, OUT_PAD]         f32
    out_ref,    # [bt, OUT_PAD]        f32    cols 0..act_dim-1 = mean, col act_dim = value
):
    H = aw2_ref.shape[0]

    # Cast x to bf16 in-kernel (keeps the HBM copy f32, MXU eats bf16).
    x = x_ref[...].astype(jnp.bfloat16)

    # ---- fused layer 1: one matmul feeds both heads ----
    hg = jnp.dot(x, w1_ref[...], preferred_element_type=jnp.float32) + b1_ref[...]
    hg = jnp.maximum(hg, 0.0).astype(jnp.bfloat16)          # [bt, 2H]

    # ---- layer 2: separate hidden weights per head ----
    h2 = jnp.dot(hg[:, :H], aw2_ref[...], preferred_element_type=jnp.float32)
    g2 = jnp.dot(hg[:, H:], cw2_ref[...], preferred_element_type=jnp.float32)
    hg2 = jnp.concatenate([h2, g2], axis=-1) + b2_ref[...]   # [bt, 2H] f32
    hg2 = jnp.maximum(hg2, 0.0).astype(jnp.bfloat16)

    # ---- fused layer 3: block-diagonal weight emits [mean | value | 0-pad]
    #      as one lane-dense [bt, OUT_PAD] store ----
    out_ref[...] = (
        jnp.dot(hg2, w3_ref[...], preferred_element_type=jnp.float32) + b3_ref[...]
    )


# ---------------------------------------------------------------------------
# Wrapper
# ---------------------------------------------------------------------------
def actor_critic_forward(x, packed, *, batch_tile=1024):
    """Forward pass matching the PyTorch ActorCritic module.

    x:      [B, obs_dim] float32
    packed: dict produced by pack_params() (bf16 weights, fused layouts).
    Returns (mean [B, act_dim], std [act_dim], value [B, 1]).
    """
    B, obs_dim = x.shape
    act_dim = packed["act_dim"]
    out_pad = packed["w3"].shape[1]

    # std is state-independent -> compute outside the kernel (perf review).
    std = jnp.exp(packed["log_std"])

    weight_ops = (
        packed["w1"], packed["b1"],
        packed["aw2"], packed["cw2"], packed["b2"],
        packed["w3"], packed["b3"],
    )

    if B <= batch_tile:
        # Single invocation, no grid: whole-array VMEM blocks, no pipeline
        # machinery, no double-buffering of weights.
        in_specs = [pl.BlockSpec(memory_space=pltpu.MemorySpace.VMEM)
                    for _ in range(1 + len(weight_ops))]
        out = pl.pallas_call(
            _actor_critic_kernel,
            out_shape=jax.ShapeDtypeStruct((B, out_pad), jnp.float32),
            in_specs=in_specs,
            out_specs=pl.BlockSpec(memory_space=pltpu.MemorySpace.VMEM),
        )(x, *weight_ops)
    else:
        # Large batch: grid over the batch axis, weights resident in VMEM
        # across the grid (constant index maps), batch axis parallel.
        bt = batch_tile
        assert bt % 8 == 0, "batch_tile must be a multiple of 8 (sublane)"
        num_tiles = pl.cdiv(B, bt)
        Bp = num_tiles * bt
        xp = x if Bp == B else jnp.pad(x, ((0, Bp - B), (0, 0)))

        def const_spec(a):
            return pl.BlockSpec(a.shape, lambda i: (0,) * a.ndim)

        in_specs = [pl.BlockSpec((bt, obs_dim), lambda i: (i, 0))]
        in_specs += [const_spec(a) for a in weight_ops]

        out = pl.pallas_call(
            _actor_critic_kernel,
            out_shape=jax.ShapeDtypeStruct((Bp, out_pad), jnp.float32),
            grid=(num_tiles,),
            in_specs=in_specs,
            out_specs=pl.BlockSpec((bt, out_pad), lambda i: (i, 0)),
            compiler_params=pltpu.CompilerParams(
                dimension_semantics=("parallel",)),
        )(xp, *weight_ops)
        out = out[:B]

    mean = out[:, :act_dim]
    value = out[:, act_dim:act_dim + 1]
    return mean, std, value


# ---------------------------------------------------------------------------
# Parameter init (PyTorch nn.Linear-style) and packing for the kernel
# ---------------------------------------------------------------------------
def init_params(key, obs_dim, act_dim, hidden=256):
    """Deterministic PyTorch-Linear-style init (uniform +-1/sqrt(fan_in)), f32."""
    ks = jax.random.split(key, 12)

    def linear(kw, kb, fan_in, fan_out):
        bound = 1.0 / jnp.sqrt(jnp.float32(fan_in))
        w = jax.random.uniform(kw, (fan_in, fan_out), jnp.float32, -bound, bound)
        b = jax.random.uniform(kb, (1, fan_out), jnp.float32, -bound, bound)
        return w, b

    aw1, ab1 = linear(ks[0], ks[1], obs_dim, hidden)
    aw2, ab2 = linear(ks[2], ks[3], hidden, hidden)
    aw3, ab3 = linear(ks[4], ks[5], hidden, act_dim)
    cw1, cb1 = linear(ks[6], ks[7], obs_dim, hidden)
    cw2, cb2 = linear(ks[8], ks[9], hidden, hidden)
    cw3, cb3 = linear(ks[10], ks[11], hidden, 1)
    log_std = jnp.zeros((act_dim,), jnp.float32)   # torch.ones(act_dim) * 0.0

    return dict(
        aw1=aw1, ab1=ab1, aw2=aw2, ab2=ab2, aw3=aw3, ab3=ab3,
        cw1=cw1, cb1=cb1, cw2=cw2, cb2=cb2, cw3=cw3, cb3=cb3,
        log_std=log_std,
    )


def pack_params(p):
    """Fuse + quantize module parameters into the kernel's operand layout."""
    hidden = p["aw2"].shape[0]
    act_dim = p["aw3"].shape[1]
    out_dim = act_dim + 1                       # mean columns + one value column
    out_pad = ((out_dim + 127) // 128) * 128    # lane-dense output slab

    # fused layer 1: [obs_dim, 2H] bf16, bias f32
    w1 = jnp.concatenate([p["aw1"], p["cw1"]], axis=1).astype(jnp.bfloat16)
    b1 = jnp.concatenate([p["ab1"], p["cb1"]], axis=1)

    # layer 2: per-head bf16 weights, fused f32 bias
    aw2 = p["aw2"].astype(jnp.bfloat16)
    cw2 = p["cw2"].astype(jnp.bfloat16)
    b2 = jnp.concatenate([p["ab2"], p["cb2"]], axis=1)

    # fused layer 3: block-diagonal [2H, out_pad] bf16 (mean cols, then value col)
    w3 = jnp.zeros((2 * hidden, out_pad), jnp.float32)
    w3 = w3.at[:hidden, :act_dim].set(p["aw3"])
    w3 = w3.at[hidden:, act_dim:act_dim + 1].set(p["cw3"])
    w3 = w3.astype(jnp.bfloat16)

    b3 = jnp.zeros((1, out_pad), jnp.float32)
    b3 = b3.at[0, :act_dim].set(p["ab3"][0])
    b3 = b3.at[0, act_dim].set(p["cb3"][0, 0])

    # TODO(synk): optional int8 (v5e/v6e) or fp8 (v7x) quantization of aw2/cw2.
    return dict(
        w1=w1, b1=b1, aw2=aw2, cw2=cw2, b2=b2, w3=w3, b3=b3,
        log_std=p["log_std"], act_dim=act_dim, hidden=hidden,
    )


# ---------------------------------------------------------------------------
# References
# ---------------------------------------------------------------------------
def reference_forward(x, p):
    """Pure-JAX f32 reference matching the PyTorch module semantics."""
    def mlp(x, w1, b1, w2, b2, w3, b3):
        h = jnp.maximum(x @ w1 + b1, 0.0)
        h = jnp.maximum(h @ w2 + b2, 0.0)
        return h @ w3 + b3

    mean = mlp(x, p["aw1"], p["ab1"], p["aw2"], p["ab2"], p["aw3"], p["ab3"])
    value = mlp(x, p["cw1"], p["cb1"], p["cw2"], p["cb2"], p["cw3"], p["cb3"])
    std = jnp.exp(p["log_std"])
    return mean, std, value


def reference_forward_bf16(x, p):
    """Reference that mimics the kernel's mixed precision exactly
    (bf16 matmul operands, f32 bias/accumulation)."""
    def bf(a):
        return a.astype(jnp.bfloat16).astype(jnp.float32)

    def mlp(x, w1, b1, w2, b2, w3, b3):
        h = jnp.maximum(bf(x) @ bf(w1) + b1, 0.0)
        h = jnp.maximum(bf(h) @ bf(w2) + b2, 0.0)
        return bf(h) @ bf(w3) + b3

    mean = mlp(x, p["aw1"], p["ab1"], p["aw2"], p["ab2"], p["aw3"], p["ab3"])
    value = mlp(x, p["cw1"], p["cb1"], p["cw2"], p["cb2"], p["cw3"], p["cb3"])
    std = jnp.exp(p["log_std"])
    return mean, std, value


# ---------------------------------------------------------------------------
# Main
# ---------------------------------------------------------------------------
if __name__ == "__main__":
    OBS_DIM, ACT_DIM, HIDDEN = 16, 4, 256

    key = jax.random.PRNGKey(0)
    kx, kx_big, kp = jax.random.split(key, 3)

    params = init_params(kp, OBS_DIM, ACT_DIM, HIDDEN)
    packed = pack_params(params)

    # ---- small batch: single-invocation (no grid) path ----
    B = 8
    x = jax.random.normal(kx, (B, OBS_DIM), jnp.float32)
    mean, std, value = actor_critic_forward(x, packed)
    jax.block_until_ready((mean, std, value))

    assert mean.shape == (B, ACT_DIM)
    assert std.shape == (ACT_DIM,)
    assert value.shape == (B, 1)

    mean_r, std_r, value_r = reference_forward(x, params)
    mean_q, _, value_q = reference_forward_bf16(x, params)

    # tight check against the precision-matched (bf16-weight) reference
    assert jnp.allclose(mean, mean_q, atol=2e-3, rtol=2e-3)
    assert jnp.allclose(value, value_q, atol=2e-3, rtol=2e-3)
    # semantic check against the f32 module reference (bf16 quantization slack)
    assert jnp.allclose(mean, mean_r, atol=5e-2, rtol=5e-2)
    assert jnp.allclose(value, value_r, atol=5e-2, rtol=5e-2)
    assert jnp.allclose(std, std_r, atol=1e-6, rtol=1e-6)

    # ---- larger batch: tiled path (weights resident, parallel batch grid) ----
    BB = 256
    xb = jax.random.normal(kx_big, (BB, OBS_DIM), jnp.float32)
    mean_b, std_b, value_b = actor_critic_forward(xb, packed, batch_tile=128)
    jax.block_until_ready((mean_b, std_b, value_b))

    mean_bq, _, value_bq = reference_forward_bf16(xb, params)
    assert mean_b.shape == (BB, ACT_DIM) and value_b.shape == (BB, 1)
    assert jnp.allclose(mean_b, mean_bq, atol=2e-3, rtol=2e-3)
    assert jnp.allclose(value_b, value_bq, atol=2e-3, rtol=2e-3)
    assert jnp.allclose(std_b, std_r, atol=1e-6, rtol=1e-6)

    print("KERNEL_OK")
</pallas_src>

<mosaic_0001>
module attributes {stable_mosaic.version = 11 : i64} {
  func.func @_actor_critic_kernel(%arg0: memref<8x16xf32, #tpu.memory_space<vmem>>, %arg1: memref<16x512xbf16, #tpu.memory_space<vmem>>, %arg2: memref<1x512xf32, #tpu.memory_space<vmem>>, %arg3: memref<256x256xbf16, #tpu.memory_space<vmem>>, %arg4: memref<256x256xbf16, #tpu.memory_space<vmem>>, %arg5: memref<1x512xf32, #tpu.memory_space<vmem>>, %arg6: memref<512x128xbf16, #tpu.memory_space<vmem>>, %arg7: memref<1x128xf32, #tpu.memory_space<vmem>>, %arg8: memref<8x128xf32, #tpu.memory_space<vmem>>) attributes {dimension_semantics = [], scalar_prefetch = 0 : i64, scratch_operands = 0 : i64, tpu.core_type = #tpu.core_type<tc>} {
    %c0 = arith.constant 0 : index
    %c0_0 = arith.constant 0 : index
    %0 = vector.load %arg0[%c0, %c0_0] : memref<8x16xf32, #tpu.memory_space<vmem>>, vector<8x16xf32>
    %1 = arith.truncf %0 : vector<8x16xf32> to vector<8x16xbf16>
    %c0_1 = arith.constant 0 : index
    %c0_2 = arith.constant 0 : index
    %2 = vector.load %arg1[%c0_1, %c0_2] : memref<16x512xbf16, #tpu.memory_space<vmem>>, vector<16x512xbf16>
    %cst = arith.constant dense<0.000000e+00> : vector<8x512xf32>
    %3 = tpu.matmul %1, %2, %cst {dimension_numbers = #tpu.dot_dimension_numbers<[1], [0], [0], [1], [0, 0, 1, 1], [], []>} : vector<8x16xbf16>, vector<16x512xbf16>, vector<8x512xf32> -> vector<8x512xf32>
    %c0_3 = arith.constant 0 : index
    %c0_4 = arith.constant 0 : index
    %4 = vector.load %arg2[%c0_3, %c0_4] : memref<1x512xf32, #tpu.memory_space<vmem>>, vector<1x512xf32>
    %5 = vector.broadcast %4 : vector<1x512xf32> to vector<8x512xf32>
    %6 = arith.addf %3, %5 : vector<8x512xf32>
    %cst_5 = arith.constant 0.000000e+00 : f32
    %7 = vector.broadcast %cst_5 : f32 to vector<8x512xf32>
    %8 = arith.maximumf %6, %7 : vector<8x512xf32>
    %9 = arith.truncf %8 : vector<8x512xf32> to vector<8x512xbf16>
    %10 = vector.extract_strided_slice %9 {offsets = [0, 0], sizes = [8, 256], strides = [1, 1]} : vector<8x512xbf16> to vector<8x256xbf16>
    %c0_6 = arith.constant 0 : index
    %c0_7 = arith.constant 0 : index
    %11 = vector.load %arg3[%c0_6, %c0_7] : memref<256x256xbf16, #tpu.memory_space<vmem>>, vector<256x256xbf16>
    %cst_8 = arith.constant dense<0.000000e+00> : vector<8x256xf32>
    %12 = tpu.matmul %10, %11, %cst_8 {dimension_numbers = #tpu.dot_dimension_numbers<[1], [0], [0], [1], [0, 0, 1, 1], [], []>} : vector<8x256xbf16>, vector<256x256xbf16>, vector<8x256xf32> -> vector<8x256xf32>
    %13 = vector.extract_strided_slice %9 {offsets = [0, 256], sizes = [8, 256], strides = [1, 1]} : vector<8x512xbf16> to vector<8x256xbf16>
    %c0_9 = arith.constant 0 : index
    %c0_10 = arith.constant 0 : index
    %14 = vector.load %arg4[%c0_9, %c0_10] : memref<256x256xbf16, #tpu.memory_space<vmem>>, vector<256x256xbf16>
    %cst_11 = arith.constant dense<0.000000e+00> : vector<8x256xf32>
    %15 = tpu.matmul %13, %14, %cst_11 {dimension_numbers = #tpu.dot_dimension_numbers<[1], [0], [0], [1], [0, 0, 1, 1], [], []>} : vector<8x256xbf16>, vector<256x256xbf16>, vector<8x256xf32> -> vector<8x256xf32>
    %16 = tpu.concatenate %12, %15 in 1 : vector<8x256xf32>, vector<8x256xf32> -> vector<8x512xf32>
    %c0_12 = arith.constant 0 : index
    %c0_13 = arith.constant 0 : index
    %17 = vector.load %arg5[%c0_12, %c0_13] : memref<1x512xf32, #tpu.memory_space<vmem>>, vector<1x512xf32>
    %18 = vector.broadcast %17 : vector<1x512xf32> to vector<8x512xf32>
    %19 = arith.addf %16, %18 : vector<8x512xf32>
    %cst_14 = arith.constant 0.000000e+00 : f32
    %20 = vector.broadcast %cst_14 : f32 to vector<8x512xf32>
    %21 = arith.maximumf %19, %20 : vector<8x512xf32>
    %22 = arith.truncf %21 : vector<8x512xf32> to vector<8x512xbf16>
    %c0_15 = arith.constant 0 : index
    %c0_16 = arith.constant 0 : index
    %23 = vector.load %arg6[%c0_15, %c0_16] : memref<512x128xbf16, #tpu.memory_space<vmem>>, vector<512x128xbf16>
    %cst_17 = arith.constant dense<0.000000e+00> : vector<8x128xf32>
    %24 = tpu.matmul %22, %23, %cst_17 {dimension_numbers = #tpu.dot_dimension_numbers<[1], [0], [0], [1], [0, 0, 1, 1], [], []>} : vector<8x512xbf16>, vector<512x128xbf16>, vector<8x128xf32> -> vector<8x128xf32>
    %c0_18 = arith.constant 0 : index
    %c0_19 = arith.constant 0 : index
    %25 = vector.load %arg7[%c0_18, %c0_19] : memref<1x128xf32, #tpu.memory_space<vmem>>, vector<1x128xf32>
    %26 = vector.broadcast %25 : vector<1x128xf32> to vector<8x128xf32>
    %27 = arith.addf %24, %26 : vector<8x128xf32>
    %c0_20 = arith.constant 0 : index
    %c0_21 = arith.constant 0 : index
    %28 = vector.load %arg8[%c0_20, %c0_21] : memref<8x128xf32, #tpu.memory_space<vmem>>, vector<8x128xf32>
    tpu.vector_store %arg8[%c0_20, %c0_21], %27 {strides = array<i32>} : memref<8x128xf32, #tpu.memory_space<vmem>>, vector<8x128xf32>,
    return
  }
}

</mosaic_0001>

<bundles_post_ra>
// kernel: tpu_custom_call.1
= control target key start
LH: loop header
LB: loop body
LE: loop exit
PB: predicated region body
PF: predicated region fallthrough
CT: control target
= control target key end

     0   :  { %13 = vsyncpa [#allocation3], 0  ;;  %s1701_s0 = inlined_call_operand.hbm [shape: f32[8,16], index: 0, kind: input, shape index: {}]   ;;  %s1702_s1 = inlined_call_operand.hbm [shape: bf16[16,512], index: 1, kind: input, shape index: {}]   ;;  %s1703_s2 = inlined_call_operand.vmem [shape: f32[1,512], index: 2, kind: input, shape index: {}]   ;;  %s1704_s3 = inlined_call_operand.hbm [shape: bf16[256,256], index: 3, kind: input, shape index: {}]   ;;  %s1705_s4 = inlined_call_operand.hbm [shape: bf16[256,256], index: 4, kind: input, shape index: {}]   ;;  %s1706_s5 = inlined_call_operand.vmem [shape: f32[1,512], index: 5, kind: input, shape index: {}]   ;;  %s1707_s6 = inlined_call_operand.hbm [shape: bf16[512,128], index: 6, kind: input, shape index: {}]   ;;  %s1708_s7 = inlined_call_operand.vmem [shape: f32[1,128], index: 7, kind: input, shape index: {}]   ;;  %s1709_s8 = inlined_call_operand.hbm [shape: f32[8,128], index: 8, kind: output, shape index: {}]  }
   0x1   :  { %14 = vsyncpa [#allocation6], 0 }
   0x2   :  { %15 = vsyncpa [#allocation9], 0 }
   0x3   :  { %16 = vsyncpa [#allocation4], 0  ;;  %s1534_s27 = smov [#allocation5]   ;;  %s1394_s9 = scalar_lea.hbm %s1702_s1, 512 }
   0x4   :  { %s32_s28 = sshll.u32 %s1534_s27, 4  ;;  %p1395_p0 = scmp.ne.s32.totalorder %s1702_s1, %s1394_s9  ;;  %s33_s28 = int_to_ptr.vmem [resolvable:$true] %s32_s28 }
   0x5   :  { %p1398_p1 = scmp.lt.u32.totalorder %s1394_s9, %s1702_s1 }
   0x7   :  { %p1400_p2 = pnand %p1398_p1, %p1395_p0 }
   0x9   :  { %1403 = shalt.err (!%p1400_p2)
}
   0xa   :  { %s1404_s14 = scalar_lea.vmem %s33_s28, 512  ;;  %p1409_p4 = scmp.lt.s32.totalorder %s33_s28, %s33_s28 }
   0xb   :  { %p1405_p3 = scmp.ne.s32.totalorder %s33_s28, %s1404_s14  ;;  %p1410_p5 = scmp.lt.s32.totalorder %s1404_s14, %s1404_s14 }
   0xd   :  { %p1411_p6 = por %p1410_p5, %p1409_p4 }
   0xf   :  { %p1412_p7 = pnand %p1411_p6, %p1405_p3 }
  0x11   :  { %1415 = shalt.err (!%p1412_p7)
}
  0x12   :  { %s1535_s15 = smov 256   ;;  %s1536_s16 = smov 16  }
  0x13   :  { %38 = dma.hbm_to_vmem [thread:$0]  %s1702_s1, 512, %s33_s28, [#allocation6], %s1535_s15, %s1535_s15, %s1536_s16  }
  0x14   :  { %s1537_s19 = smov [#allocation8]   ;;  %s1538_s21 = smov [#allocation2]  }
  0x15   :  { %s58_s20 = sshll.u32 %s1537_s19, 4  ;;  %s23_s22 = sshll.u32 %s1538_s21, 4  ;;  %s59_s20 = int_to_ptr.vmem [resolvable:$true] %s58_s20  ;;  %s24_s22 = int_to_ptr.vmem [resolvable:$true] %s23_s22 }
  0x16   :  { %s1416_s25 = scalar_lea.hbm %s1705_s4, 4096 }
  0x17   :  { %p1417_p8 = scmp.ne.s32.totalorder %s1705_s4, %s1416_s25  ;;  %p1420_p9 = scmp.lt.u32.totalorder %s1416_s25, %s1705_s4 }
  0x19   :  { %p1422_p10 = pnand %p1420_p9, %p1417_p8 }
  0x1b   :  { %1425 = shalt.err (!%p1422_p10)
}
  0x1c   :  { %s1426_s1 = scalar_lea.vmem %s59_s20, 4096  ;;  %p1431_p12 = scmp.lt.s32.totalorder %s59_s20, %s59_s20 }
  0x1d   :  { %p1427_p11 = scmp.ne.s32.totalorder %s59_s20, %s1426_s1  ;;  %p1432_p13 = scmp.lt.s32.totalorder %s1426_s1, %s1426_s1 }
  0x1f   :  { %p1433_p0 = por %p1432_p13, %p1431_p12 }
  0x21   :  { %p1434_p1 = pnand %p1433_p0, %p1427_p11 }
  0x23   :  { %1437 = shalt.err (!%p1434_p1)
}
  0x24   :  { %s1539_s28 = smov 128   ;;  %s1540_s9 = smov 8  }
  0x25   :  { %64 = dma.hbm_to_vmem [thread:$0]  %s1705_s4, 4096, %s59_s20, [#allocation9], %s1539_s28, %s1539_s28, %s1540_s9  }
  0x26   :  { %s1438_s14 = scalar_lea.hbm %s1701_s0, 128 }
  0x27   :  { %p1439_p2 = scmp.ne.s32.totalorder %s1701_s0, %s1438_s14  ;;  %p1442_p3 = scmp.lt.u32.totalorder %s1438_s14, %s1701_s0 }
  0x29   :  { %p1444_p4 = pnand %p1442_p3, %p1439_p2 }
  0x2b   :  { %1447 = shalt.err (!%p1444_p4)
}
  0x2c   :  { %s1448_s19 = scalar_lea.vmem %s24_s22, 128  ;;  %p1453_p6 = scmp.lt.s32.totalorder %s24_s22, %s24_s22 }
  0x2d   :  { %p1449_p5 = scmp.ne.s32.totalorder %s24_s22, %s1448_s19  ;;  %p1454_p7 = scmp.lt.s32.totalorder %s1448_s19, %s1448_s19 }
  0x2f   :  { %p1455_p8 = por %p1454_p7, %p1453_p6 }
  0x31   :  { %p1456_p9 = pnand %p1455_p8, %p1449_p5 }
  0x33   :  { %1459 = shalt.err (!%p1456_p9)
}
  0x34   :  { %26 = dma.hbm_to_vmem [thread:$0]  %s1701_s0, 128, %s24_s22, [#allocation3]  }
  0x35   :  { %s1541_s21 = smov [#allocation7]   ;;  %s1542_s24 = smov [#allocation10]  }
  0x36   :  { %s46_s23 = sshll.u32 %s1541_s21, 4  ;;  %s72_s25 = sshll.u32 %s1542_s24, 4  ;;  %s47_s23 = int_to_ptr.vmem [resolvable:$true] %s46_s23  ;;  %s73_s25 = int_to_ptr.vmem [resolvable:$true] %s72_s25 }
  0x37   :  { %s1460_s29 = scalar_lea.hbm %s1704_s3, 4096 }
  0x38   :  { %p1461_p10 = scmp.ne.s32.totalorder %s1704_s3, %s1460_s29  ;;  %p1464_p11 = scmp.lt.u32.totalorder %s1460_s29, %s1704_s3 }
  0x3a   :  { %p1466_p12 = pnand %p1464_p11, %p1461_p10 }
  0x3c   :  { %1469 = shalt.err (!%p1466_p12)
}
  0x3d   :  { %s1470_s0 = scalar_lea.vmem %s47_s23, 4096  ;;  %p1475_p0 = scmp.lt.s32.totalorder %s47_s23, %s47_s23 }
  0x3e   :  { %p1471_p13 = scmp.ne.s32.totalorder %s47_s23, %s1470_s0  ;;  %p1476_p1 = scmp.lt.s32.totalorder %s1470_s0, %s1470_s0 }
  0x40   :  { %p1477_p2 = por %p1476_p1, %p1475_p0 }
  0x42   :  { %p1478_p3 = pnand %p1477_p2, %p1471_p13 }
  0x44   :  { %1481 = shalt.err (!%p1478_p3)
}
  0x45   :  { %52 = dma.hbm_to_vmem [thread:$0]  %s1704_s3, 4096, %s47_s23, [#allocation6], %s1539_s28, %s1539_s28, %s1540_s9  }
  0x46   :  { %s1482_s15 = scalar_lea.hbm %s1707_s6, 4096 }
  0x47   :  { %p1483_p4 = scmp.ne.s32.totalorder %s1707_s6, %s1482_s15  ;;  %p1486_p5 = scmp.lt.u32.totalorder %s1482_s15, %s1707_s6 }
  0x49   :  { %p1488_p6 = pnand %p1486_p5, %p1483_p4 }
  0x4b   :  { %1491 = shalt.err (!%p1488_p6)
}
  0x4c   :  { %s1492_s4 = scalar_lea.vmem %s73_s25, 4096  ;;  %p1497_p8 = scmp.lt.s32.totalorder %s73_s25, %s73_s25 }
  0x4d   :  { %p1493_p7 = scmp.ne.s32.totalorder %s73_s25, %s1492_s4  ;;  %p1498_p9 = scmp.lt.s32.totalorder %s1492_s4, %s1492_s4 }
  0x4f   :  { %p1499_p10 = por %p1498_p9, %p1497_p8 }
  0x51   :  { %p1500_p11 = pnand %p1499_p10, %p1493_p7 }
  0x53   :  { %1503 = shalt.err (!%p1500_p11)
}
  0x54   :  { %s1543_s3 = smov 64   ;;  %s1544_s28 = smov 4  }
  0x55   :  { %78 = dma.hbm_to_vmem [thread:$0]  %s1707_s6, 4096, %s73_s25, [#allocation9], %s1543_s3, %s1543_s3, %s1544_s28  }
  0x56   :  { %1526 = dma.done.wait [#allocation3], 128  }
  0x57   :  { %1527 = vsyncadd [#allocation3], 4294967168 }
  0x58   :  { %1528 = dma.done.wait [#allocation6], 4608  }
  0x59   :  { %1529 = vsyncadd [#allocation6], 4294962688 }
  0x5a   :  { %1530 = dma.done.wait [#allocation9], 8192  }
  0x5b   :  { %1531 = vsyncadd [#allocation9], 4294959104  ;;  %v1545_v0 = vmov 0   ;;  %v1260_v1 = vld [vmem:[#allocation5 + $0x4] ss:$16 sps:$4 sm:$0xff]   ;;  %v97_v5 = vld [vmem:[#allocation2] sm:$0xff] }
  0x5c   :  { %181 = vmatprep.mubr.bf16.mxu0 %v1545_v0  ;;  %222 = vmatprep.mubr.bf16.mxu1 %v1545_v0  ;;  %v1262_v2 = vld [vmem:[#allocation5 + $0xc] ss:$16 sps:$4 sm:$0xff]   ;;  %v1264_v3 = vld [vmem:[#allocation5] ss:$16 sps:$4 sm:$0xff]   ;;  %v1265_v4 = vld [vmem:[#allocation5 + $0x8] ss:$16 sps:$4 sm:$0xff]   ;;  %v98_v6 = vpack.c.bf16 %v97_v5, %v97_v5 }
  0x5d   :  { %149 = vmatprep.subr.bf16.mxu0 %v1260_v1  ;;  %190 = vmatprep.subr.bf16.mxu1 %v1262_v2  ;;  %v1266_v7 = vld [vmem:[#allocation7] ss:$8 sps:$4 sm:$0xff]   ;;  %vm145_vm0 = vcmask 130048   ;;  %v1268_v8 = vld [vmem:[#allocation7 + $0x4] ss:$8 sps:$4 sm:$0xff]   ;;  %s1546_s25 = smov [#allocation11]  }
  0x5e   :  { %150 = vmatpush1.bf16.msra.mxu0 %v1264_v3  ;;  %191 = vmatpush1.bf16.msra.mxu1 %v1265_v4  ;;  %v1269_v9 = vld [vmem:[#allocation8] ss:$8 sps:$4 sm:$0xff]   ;;  %v1271_v10 = vld [vmem:[#allocation8 + $0x4] ss:$8 sps:$4 sm:$0xff]   ;;  %v1274_v11 = vld [vmem:[#allocation7 + $0x14] ss:$8 sps:$4 sm:$0xff]  }
  0x5f   :  { %431 = vmatprep.subr.bf16.mxu0 %v1268_v8  ;;  %v1272_v12 = vld [vmem:[#allocation7 + $0x10] ss:$8 sps:$4 sm:$0xff]   ;;  %664 = vmatprep.subr.bf16.mxu1 %v1271_v10  ;;  %v1277_v13 = vld [vmem:[#allocation8 + $0x14] ss:$8 sps:$4 sm:$0xff]   ;;  %v1280_v15 = vld [vmem:[#allocation7 + $0x24] ss:$8 sps:$4 sm:$0xff]  }
  0x60   :  { %v1275_v14 = vld [vmem:[#allocation8 + $0x10] ss:$8 sps:$4 sm:$0xff]   ;;  %v1283_v16 = vld [vmem:[#allocation8 + $0x24] ss:$8 sps:$4 sm:$0xff]   ;;  %v1278_v17 = vld [vmem:[#allocation7 + $0x20] ss:$8 sps:$4 sm:$0xff]  }
  0x61   :  { %1104 = vmatmul.mubr.msk.bf16.vlgmr.msra.gmra.mrb[0].mxu0 %vm145_vm0, %v98_v6  ;;  %1105 = vmatmul.mubr.msk.bf16.vlgmr.msra.gmra.mrb[0].mxu1 %vm145_vm0, %v98_v6  ;;  %v1281_v18 = vld [vmem:[#allocation8 + $0x20] ss:$8 sps:$4 sm:$0xff]   ;;  %v1286_v19 = vld [vmem:[#allocation7 + $0x34] ss:$8 sps:$4 sm:$0xff]   ;;  %v1284_v21 = vld [vmem:[#allocation7 + $0x30] ss:$8 sps:$4 sm:$0xff]  }
  0x62   :  { %432 = vmatpush1.bf16.msra.mxu0 %v1266_v7  ;;  %665 = vmatpush1.bf16.msra.mxu1 %v1269_v9  ;;  %v1289_v20 = vld [vmem:[#allocation8 + $0x34] ss:$8 sps:$4 sm:$0xff]   ;;  %v1287_v22 = vld [vmem:[#allocation8 + $0x30] ss:$8 sps:$4 sm:$0xff]   ;;  %v1292_v23 = vld [vmem:[#allocation7 + $0x44] ss:$8 sps:$4 sm:$0xff]   ;;  %v105_v9 = vlaneseq }
  0x63   :  { %433 = vmatprep.subr.bf16.mxu0 %v1274_v11  ;;  %666 = vmatprep.subr.bf16.mxu1 %v1277_v13  ;;  %v1295_v24 = vld [vmem:[#allocation8 + $0x44] ss:$8 sps:$4 sm:$0xff]   ;;  %v1290_v25 = vld [vmem:[#allocation7 + $0x40] ss:$8 sps:$4 sm:$0xff]   ;;  %v1298_v27 = vld [vmem:[#allocation7 + $0x54] ss:$8 sps:$4 sm:$0xff]  }
  0x64   :  { %v1293_v26 = vld [vmem:[#allocation8 + $0x40] ss:$8 sps:$4 sm:$0xff]   ;;  %v1301_v28 = vld [vmem:[#allocation8 + $0x54] ss:$8 sps:$4 sm:$0xff]   ;;  %v1296_v29 = vld [vmem:[#allocation7 + $0x50] ss:$8 sps:$4 sm:$0xff]  }
  0x65   :  { %v1299_v30 = vld [vmem:[#allocation8 + $0x50] ss:$8 sps:$4 sm:$0xff]   ;;  %v1304_v31 = vld [vmem:[#allocation7 + $0x64] ss:$8 sps:$4 sm:$0xff]   ;;  %v1302_v33 = vld [vmem:[#allocation7 + $0x60] ss:$8 sps:$4 sm:$0xff]  }
  0x66   :  { %434 = vmatpush1.bf16.msra.mxu0 %v1272_v12  ;;  %667 = vmatpush1.bf16.msra.mxu1 %v1275_v14  ;;  %v1307_v32 = vld [vmem:[#allocation8 + $0x64] ss:$8 sps:$4 sm:$0xff]   ;;  %v1305_v34 = vld [vmem:[#allocation8 + $0x60] ss:$8 sps:$4 sm:$0xff]   ;;  %v1310_v35 = vld [vmem:[#allocation7 + $0x74] ss:$8 sps:$4 sm:$0xff]  }
  0x67   :  { %435 = vmatprep.subr.bf16.mxu0 %v1280_v15  ;;  %668 = vmatprep.subr.bf16.mxu1 %v1283_v16  ;;  %v1313_v36 = vld [vmem:[#allocation8 + $0x74] ss:$8 sps:$4 sm:$0xff]   ;;  %v1308_v37 = vld [vmem:[#allocation7 + $0x70] ss:$8 sps:$4 sm:$0xff]   ;;  %v1316_v39 = vld [vmem:[#allocation7 + $0x84] ss:$8 sps:$4 sm:$0xff]  }
  0x68   :  { %v1311_v38 = vld [vmem:[#allocation8 + $0x70] ss:$8 sps:$4 sm:$0xff]   ;;  %v1319_v40 = vld [vmem:[#allocation8 + $0x84] ss:$8 sps:$4 sm:$0xff]   ;;  %v1314_v41 = vld [vmem:[#allocation7 + $0x80] ss:$8 sps:$4 sm:$0xff]  }
  0x69   :  { %v1317_v42 = vld [vmem:[#allocation8 + $0x80] ss:$8 sps:$4 sm:$0xff]   ;;  %v1322_v43 = vld [vmem:[#allocation7 + $0x94] ss:$8 sps:$4 sm:$0xff]   ;;  %v1320_v44 = vld [vmem:[#allocation7 + $0x90] ss:$8 sps:$4 sm:$0xff]  }
  0x6a   :  { %436 = vmatpush1.bf16.msra.mxu0 %v1278_v17  ;;  %669 = vmatpush1.bf16.msra.mxu1 %v1281_v18  ;;  %v1325_v45 = vld [vmem:[#allocation8 + $0x94] ss:$8 sps:$4 sm:$0xff]   ;;  %v1323_v46 = vld [vmem:[#allocation8 + $0x90] ss:$8 sps:$4 sm:$0xff]   ;;  %v1328_v47 = vld [vmem:[#allocation7 + $0xa4] ss:$8 sps:$4 sm:$0xff]  }
  0x6b   :  { %437 = vmatprep.subr.bf16.mxu0 %v1286_v19  ;;  %670 = vmatprep.subr.bf16.mxu1 %v1289_v20  ;;  %v1331_v48 = vld [vmem:[#allocation8 + $0xa4] ss:$8 sps:$4 sm:$0xff]   ;;  %v1326_v49 = vld [vmem:[#allocation7 + $0xa0] ss:$8 sps:$4 sm:$0xff]   ;;  %v1334_v51 = vld [vmem:[#allocation7 + $0xb4] ss:$8 sps:$4 sm:$0xff]  }
  0x6c   :  { %v1329_v50 = vld [vmem:[#allocation8 + $0xa0] ss:$8 sps:$4 sm:$0xff]   ;;  %v1337_v52 = vld [vmem:[#allocation8 + $0xb4] ss:$8 sps:$4 sm:$0xff]   ;;  %v1332_v53 = vld [vmem:[#allocation7 + $0xb0] ss:$8 sps:$4 sm:$0xff]  }
  0x6d   :  { %v1335_v54 = vld [vmem:[#allocation8 + $0xb0] ss:$8 sps:$4 sm:$0xff]   ;;  %v1340_v55 = vld [vmem:[#allocation7 + $0xc4] ss:$8 sps:$4 sm:$0xff]   ;;  %v1338_v57 = vld [vmem:[#allocation7 + $0xc0] ss:$8 sps:$4 sm:$0xff]  }
  0x6e   :  { %438 = vmatpush1.bf16.msra.mxu0 %v1284_v21  ;;  %671 = vmatpush1.bf16.msra.mxu1 %v1287_v22  ;;  %v1343_v56 = vld [vmem:[#allocation8 + $0xc4] ss:$8 sps:$4 sm:$0xff]   ;;  %v1341_v58 = vld [vmem:[#allocation8 + $0xc0] ss:$8 sps:$4 sm:$0xff]   ;;  %v1346_v59 = vld [vmem:[#allocation7 + $0xd4] ss:$8 sps:$4 sm:$0xff]  }
  0x6f   :  { %439 = vmatprep.subr.bf16.mxu0 %v1292_v23  ;;  %672 = vmatprep.subr.bf16.mxu1 %v1295_v24  ;;  %v1349_v60 = vld [vmem:[#allocation8 + $0xd4] ss:$8 sps:$4 sm:$0xff]   ;;  %v1344_v61 = vld [vmem:[#allocation7 + $0xd0] ss:$8 sps:$4 sm:$0xff]   ;;  %v1352_v63 = vld [vmem:[#allocation7 + $0xe4] ss:$8 sps:$4 sm:$0xff]  }
  0x70   :  { %v1347_v62 = vld [vmem:[#allocation8 + $0xd0] ss:$8 sps:$4 sm:$0xff]   ;;  %v1355_v0 = vld [vmem:[#allocation8 + $0xe4] ss:$8 sps:$4 sm:$0xff]   ;;  %v1350_v1 = vld [vmem:[#allocation7 + $0xe0] ss:$8 sps:$4 sm:$0xff]  }
  0x71   :  { %v1353_v2 = vld [vmem:[#allocation8 + $0xe0] ss:$8 sps:$4 sm:$0xff]   ;;  %v1358_v3 = vld [vmem:[#allocation7 + $0xf4] ss:$8 sps:$4 sm:$0xff]   ;;  %v1356_v5 = vld [vmem:[#allocation7 + $0xf0] ss:$8 sps:$4 sm:$0xff]  }
  0x72   :  { %440 = vmatpush1.bf16.msra.mxu0 %v1290_v25  ;;  %673 = vmatpush1.bf16.msra.mxu1 %v1293_v26  ;;  %v1361_v4 = vld [vmem:[#allocation8 + $0xf4] ss:$8 sps:$4 sm:$0xff]   ;;  %v1359_v6 = vld [vmem:[#allocation8 + $0xf0] ss:$8 sps:$4 sm:$0xff]   ;;  %v1362_v7 = vld [vmem:[#allocation10 + $0x40] sm:$0xff]   ;;  %v1658_v10 = vshrl.u32 %v105_v9, 7 }
  0x73   :  { %441 = vmatprep.subr.bf16.mxu0 %v1298_v27  ;;  %674 = vmatprep.subr.bf16.mxu1 %v1301_v28  ;;  %v1363_v8 = vld [vmem:[#allocation10 + $0xc0] sm:$0xff]   ;;  %v103_v13 = vld [vmem:[%s1703_s2] sm:$0xf]  ;;  %s1089_s26 = sshll.u32 %s1546_s25, 4  ;;  %s1090_s26 = int_to_ptr.vmem [resolvable:$true] %s1089_s26 }
  0x74   :  { %v107_v11 = vsub.s32 0, %v1658_v10  ;;  %v115_v12 = vsub.s32 2, %v1658_v10  ;;  %v111_v14 = vsub.s32 1, %v1658_v10  ;;  %v119_v15 = vsub.s32 3, %v1658_v10  ;;  %s1504_s27 = scalar_lea.vmem %s1090_s26, 128  ;;  %p1509_p13 = scmp.lt.s32.totalorder %s1090_s26, %s1090_s26 }
  0x75   :  { %p1505_p12 = scmp.ne.s32.totalorder %s1090_s26, %s1504_s27  ;;  %p1510_p0 = scmp.lt.s32.totalorder %s1504_s27, %s1504_s27 }
  0x76   :  { %442 = vmatpush1.bf16.msra.mxu0 %v1296_v29  ;;  %675 = vmatpush1.bf16.msra.mxu1 %v1299_v30  ;;  %v108_v16 = vrot.slane %v103_v13, %v107_v11  ;;  %v116_v17 = vrot.slane %v103_v13, %v115_v12  ;;  %v112_v18 = vrot.slane %v103_v13, %v111_v14 }
  0x77   :  { %443 = vmatprep.subr.bf16.mxu0 %v1304_v31  ;;  %676 = vmatprep.subr.bf16.mxu1 %v1307_v32  ;;  %v120_v19 = vrot.slane %v103_v13, %v119_v15  ;;  %p1511_p1 = por %p1510_p0, %p1509_p13 }
  0x79   :  { %p1512_p2 = pnand %p1511_p1, %p1505_p12 }
  0x7a   :  { %444 = vmatpush1.bf16.msra.mxu0 %v1302_v33  ;;  %677 = vmatpush1.bf16.msra.mxu1 %v1305_v34 }
  0x7b   :  { %445 = vmatprep.subr.bf16.mxu0 %v1310_v35  ;;  %678 = vmatprep.subr.bf16.mxu1 %v1313_v36 }
  0x7e   :  { %446 = vmatpush1.bf16.msra.mxu0 %v1308_v37  ;;  %679 = vmatpush1.bf16.msra.mxu1 %v1311_v38 }
  0x7f   :  { %447 = vmatprep.subr.bf16.mxu0 %v1316_v39  ;;  %680 = vmatprep.subr.bf16.mxu1 %v1319_v40  ;;  %v1364_v39 = vld [vmem:[#allocation10] sm:$0xff]  }
  0x80   :  { %v1365_v40 = vld [vmem:[#allocation10 + $0x80] sm:$0xff]  }
  0x82   :  { %448 = vmatpush1.bf16.msra.mxu0 %v1314_v41  ;;  %681 = vmatpush1.bf16.msra.mxu1 %v1317_v42  ;;  %v1366_v42 = vld [vmem:[#allocation10 + $0x48] sm:$0xff]  }
  0x83   :  { %449 = vmatprep.subr.bf16.mxu0 %v1322_v43  ;;  %682 = vmatprep.subr.bf16.mxu1 %v1325_v45  ;;  %v1367_v43 = vld [vmem:[#allocation10 + $0xc8] sm:$0xff]  }
  0x84   :  { %v1369_v45 = vld [vmem:[#allocation10 + $0x88] sm:$0xff]  }
  0x86   :  { %450 = vmatpush1.bf16.msra.mxu0 %v1320_v44  ;;  %683 = vmatpush1.bf16.msra.mxu1 %v1323_v46  ;;  %v1368_v44 = vld [vmem:[#allocation10 + $0x8] sm:$0xff]   ;;  %v1370_v46 = vld [vmem:[#allocation10 + $0x50] sm:$0xff]  }
  0x87   :  { %451 = vmatprep.subr.bf16.mxu0 %v1328_v47  ;;  %684 = vmatprep.subr.bf16.mxu1 %v1331_v48  ;;  %v1371_v47 = vld [vmem:[#allocation10 + $0xd0] sm:$0xff]  }
  0x88   :  { %v1372_v48 = vld [vmem:[#allocation10 + $0x10] sm:$0xff]  }
  0x8a   :  { %452 = vmatpush1.bf16.msra.mxu0 %v1326_v49  ;;  %685 = vmatpush1.bf16.msra.mxu1 %v1329_v50  ;;  %v1373_v49 = vld [vmem:[#allocation10 + $0x90] sm:$0xff]   ;;  %v1374_v50 = vld [vmem:[#allocation10 + $0x58] sm:$0xff]  }
  0x8b   :  { %453 = vmatprep.subr.bf16.mxu0 %v1334_v51  ;;  %686 = vmatprep.subr.bf16.mxu1 %v1337_v52  ;;  %v1375_v51 = vld [vmem:[#allocation10 + $0xd8] sm:$0xff]  }
  0x8c   :  { %v1376_v52 = vld [vmem:[#allocation10 + $0x18] sm:$0xff]  }
  0x8e   :  { %454 = vmatpush1.bf16.msra.mxu0 %v1332_v53  ;;  %687 = vmatpush1.bf16.msra.mxu1 %v1335_v54  ;;  %v1377_v53 = vld [vmem:[#allocation10 + $0x98] sm:$0xff]   ;;  %v1378_v54 = vld [vmem:[#allocation10 + $0x60] sm:$0xff]  }
  0x8f   :  { %455 = vmatprep.subr.bf16.mxu0 %v1340_v55  ;;  %688 = vmatprep.subr.bf16.mxu1 %v1343_v56  ;;  %v1379_v55 = vld [vmem:[#allocation10 + $0xe0] sm:$0xff]  }
  0x90   :  { %v1380_v56 = vld [vmem:[#allocation10 + $0x20] sm:$0xff]  }
  0x92   :  { %456 = vmatpush1.bf16.msra.mxu0 %v1338_v57  ;;  %689 = vmatpush1.bf16.msra.mxu1 %v1341_v58  ;;  %v1381_v57 = vld [vmem:[#allocation10 + $0xa0] sm:$0xff]   ;;  %v1382_v58 = vld [vmem:[#allocation10 + $0x68] sm:$0xff]  }
  0x93   :  { %457 = vmatprep.subr.bf16.mxu0 %v1346_v59  ;;  %690 = vmatprep.subr.bf16.mxu1 %v1349_v60  ;;  %v1383_v59 = vld [vmem:[#allocation10 + $0xe8] sm:$0xff]  }
  0x94   :  { %v1384_v60 = vld [vmem:[#allocation10 + $0x28] sm:$0xff]  }
  0x96   :  { %458 = vmatpush1.bf16.msra.mxu0 %v1344_v61  ;;  %691 = vmatpush1.bf16.msra.mxu1 %v1347_v62  ;;  %v1385_v61 = vld [vmem:[#allocation10 + $0xa8] sm:$0xff]   ;;  %v1386_v62 = vld [vmem:[#allocation10 + $0x70] sm:$0xff]  }
  0x97   :  { %459 = vmatprep.subr.bf16.mxu0 %v1352_v63  ;;  %692 = vmatprep.subr.bf16.mxu1 %v1355_v0  ;;  %v1387_v63 = vld [vmem:[#allocation10 + $0xf0] sm:$0xff]  }
  0x98   :  { %v1388_v0 = vld [vmem:[#allocation10 + $0x30] sm:$0xff]  }
  0x9a   :  { %460 = vmatpush1.bf16.msra.mxu0 %v1350_v1  ;;  %693 = vmatpush1.bf16.msra.mxu1 %v1353_v2  ;;  %v1389_v1 = vld [vmem:[#allocation10 + $0xb0] sm:$0xff]   ;;  %v1390_v2 = vld [vmem:[#allocation10 + $0x78] sm:$0xff]  }
  0x9b   :  { %461 = vmatprep.subr.bf16.mxu0 %v1358_v3  ;;  %694 = vmatprep.subr.bf16.mxu1 %v1361_v4  ;;  %v1391_v3 = vld [vmem:[#allocation10 + $0xf8] sm:$0xff]  }
  0x9c   :  { %v1392_v4 = vld [vmem:[#allocation10 + $0x38] sm:$0xff]  }
  0x9e   :  { %462 = vmatpush1.bf16.msra.mxu0 %v1356_v5  ;;  %695 = vmatpush1.bf16.msra.mxu1 %v1359_v6  ;;  %v1393_v5 = vld [vmem:[#allocation10 + $0xb8] sm:$0xff]  }
  0x9f   :  { %1203 = vmatprep.subr.bf16.mxu0 %v1362_v7  ;;  %1225 = vmatprep.subr.bf16.mxu1 %v1363_v8  ;;  %v705_v6 = vld [vmem:[%s1706_s5] sm:$0xf] }
  0xa0   :  { %v710_v7 = vrot.slane %v705_v6, %v107_v11  ;;  %v718_v8 = vrot.slane %v705_v6, %v115_v12  ;;  %v714_v9 = vrot.slane %v705_v6, %v111_v14  ;;  %v722_v13 = vrot.slane %v705_v6, %v119_v15 }
 0x134   :  { %v183_v20 = vpop.f32.mrb[0].mxu0  ;;  %v224_v21 = vpop.f32.mrb[0].mxu1 }
 0x135   :  { %v184_v22 = vadd.f32 %v183_v20, %v108_v16  ;;  %v225_v23 = vadd.f32 %v224_v21, %v116_v17  ;;  %v185_v24 = vpop.f32.mrb[1].mxu0  ;;  %v226_v25 = vpop.f32.mrb[1].mxu1 }
 0x136   :  { %v186_v26 = vadd.f32 %v185_v24, %v112_v18  ;;  %v227_v27 = vadd.f32 %v226_v25, %v120_v19  ;;  %v187_v28 = vpop.f32.mrb[2].mxu0  ;;  %v228_v29 = vpop.f32.mrb[2].mxu1 }
 0x137   :  { %v231_v30 = vmax.f32 %v184_v22, 0.0  ;;  %v233_v31 = vmax.f32 %v225_v23, 0.0  ;;  %v188_v32 = vpop.f32.mrb[3].mxu0  ;;  %v229_v33 = vpop.f32.mrb[3].mxu1 }
 0x138   :  { %v232_v34 = vmax.f32 %v186_v26, 0.0  ;;  %v234_v35 = vmax.f32 %v227_v27, 0.0  ;;  %v1170_v33 = vld [vmem:[%s1708_s7] ss:$0 sm:$0xff] }
 0x139   :  { %v237_v36 = vpack.c.bf16 %v233_v31, %v233_v31  ;;  %v235_v41 = vpack.c.bf16 %v231_v30, %v231_v30 }
 0x13a   :  { %v236_v37 = vpack.c.bf16 %v232_v34, %v232_v34  ;;  %v238_v38 = vpack.c.bf16 %v234_v35, %v234_v35 }
 0x13c   :  { %463 = vmatprep.mubr.bf16.mxu0 %v236_v37  ;;  %696 = vmatprep.mubr.bf16.mxu1 %v238_v38 }
 0x13d   :  { %464 = vmatmul.mubr.bf16.vlgmr.msra.gmra.mrb[4].mxu0 %v235_v41  ;;  %697 = vmatmul.mubr.bf16.vlgmr.msra.gmra.mrb[4].mxu1 %v237_v36 }
 0x13e   :  { %1204 = vmatpush3.bf16.msra.mxu0 %v1364_v39  ;;  %1226 = vmatpush3.bf16.msra.mxu1 %v1365_v40 }
 0x13f   :  { %1205 = vmatprep.subr.bf16.mxu0 %v1366_v42  ;;  %1227 = vmatprep.subr.bf16.mxu1 %v1367_v43 }
 0x142   :  { %1206 = vmatpush3.bf16.msra.mxu0 %v1368_v44  ;;  %1228 = vmatpush3.bf16.msra.mxu1 %v1369_v45 }
 0x143   :  { %1207 = vmatprep.subr.bf16.mxu0 %v1370_v46  ;;  %1229 = vmatprep.subr.bf16.mxu1 %v1371_v47 }
 0x146   :  { %1208 = vmatpush3.bf16.msra.mxu0 %v1372_v48  ;;  %1230 = vmatpush3.bf16.msra.mxu1 %v1373_v49 }
 0x147   :  { %1209 = vmatprep.subr.bf16.mxu0 %v1374_v50  ;;  %1231 = vmatprep.subr.bf16.mxu1 %v1375_v51 }
 0x14a   :  { %1210 = vmatpush3.bf16.msra.mxu0 %v1376_v52  ;;  %1232 = vmatpush3.bf16.msra.mxu1 %v1377_v53 }
 0x14b   :  { %1211 = vmatprep.subr.bf16.mxu0 %v1378_v54  ;;  %1233 = vmatprep.subr.bf16.mxu1 %v1379_v55 }
 0x14e   :  { %1212 = vmatpush3.bf16.msra.mxu0 %v1380_v56  ;;  %1234 = vmatpush3.bf16.msra.mxu1 %v1381_v57 }
 0x14f   :  { %1213 = vmatprep.subr.bf16.mxu0 %v1382_v58  ;;  %1235 = vmatprep.subr.bf16.mxu1 %v1383_v59 }
 0x152   :  { %1214 = vmatpush3.bf16.msra.mxu0 %v1384_v60  ;;  %1236 = vmatpush3.bf16.msra.mxu1 %v1385_v61 }
 0x153   :  { %1215 = vmatprep.subr.bf16.mxu0 %v1386_v62  ;;  %1237 = vmatprep.subr.bf16.mxu1 %v1387_v63 }
 0x156   :  { %1216 = vmatpush3.bf16.msra.mxu0 %v1388_v0  ;;  %1238 = vmatpush3.bf16.msra.mxu1 %v1389_v1 }
 0x157   :  { %1217 = vmatprep.subr.bf16.mxu0 %v1390_v2  ;;  %1239 = vmatprep.subr.bf16.mxu1 %v1391_v3 }
 0x15a   :  { %1218 = vmatpush3.bf16.msra.mxu0 %v1392_v4  ;;  %1240 = vmatpush3.bf16.msra.mxu1 %v1393_v5 }
 0x210   :  { %v465_v16 = vpop.f32.mrb[4].mxu0  ;;  %v698_v17 = vpop.f32.mrb[4].mxu1 }
 0x211   :  { %v727_v18 = vadd.f32 %v710_v7, %v465_v16  ;;  %v729_v19 = vadd.f32 %v718_v8, %v698_v17  ;;  %v467_v20 = vpop.f32.mrb[5].mxu0  ;;  %v700_v21 = vpop.f32.mrb[5].mxu1 }
 0x212   :  { %v728_v22 = vadd.f32 %v714_v9, %v467_v20  ;;  %v730_v23 = vadd.f32 %v722_v13, %v700_v21  ;;  %v469_v24 = vpop.f32.mrb[6].mxu0  ;;  %v702_v25 = vpop.f32.mrb[6].mxu1 }
 0x213   :  { %v731_v11 = vmax.f32 %v727_v18, 0.0  ;;  %v733_v26 = vmax.f32 %v729_v19, 0.0  ;;  %v470_v27 = vpop.f32.mrb[7].mxu0  ;;  %v703_v12 = vpop.f32.mrb[7].mxu1 }
 0x214   :  { %v732_v28 = vmax.f32 %v728_v22, 0.0  ;;  %v734_v29 = vmax.f32 %v730_v23, 0.0 }
 0x215   :  { %v735_v10 = vpack.c.bf16 %v731_v11, %v731_v11  ;;  %v737_v15 = vpack.c.bf16 %v733_v26, %v733_v26 }
 0x216   :  { %v736_v14 = vpack.c.bf16 %v732_v28, %v732_v28  ;;  %v738_v30 = vpack.c.bf16 %v734_v29, %v734_v29 }
 0x218   :  { %1034 = vmatprep.mubr.bf16.mxu0 %v736_v14  ;;  %1074 = vmatprep.mubr.bf16.mxu1 %v738_v30 }
 0x219   :  { %1035 = vmatmul.mubr.bf16.vlgmr.msra.gmra.mrb[8].mxu0 %v735_v10  ;;  %1075 = vmatmul.mubr.bf16.vlgmr.msra.gmra.mrb[8].mxu1 %v737_v15 }
 0x2ec   :  { %v1219_v31 = vpop.f32.mrb[8].mxu0  ;;  %v1241_v32 = vpop.f32.mrb[8].mxu1 }
 0x2ed   :  { %v1220_v34 = vpop.f32.mrb[9].mxu0  ;;  %v1242_v35 = vpop.f32.mrb[9].mxu1 }
 0x2ee   :  { %v1221_v36 = vadd.f32 %v1220_v34, %v1219_v31  ;;  %v1243_v37 = vadd.f32 %v1242_v35, %v1241_v32  ;;  %v1222_v38 = vpop.f32.mrb[10].mxu0  ;;  %v1244_v39 = vpop.f32.mrb[10].mxu1 }
 0x2ef   :  { %v1223_v40 = vpop.f32.mrb[11].mxu0  ;;  %v1245_v41 = vpop.f32.mrb[11].mxu1 }
 0x2f0   :  { %v1037_v42 = vadd.f32 %v1221_v36, %v1170_v33 }
 0x2f2   :  { %v1077_v43 = vadd.f32 %v1243_v37, %v1037_v42 }
 0x2f4   :  { %1082 = vst [vmem:[#allocation11] sm:$0xff] %v1077_v43 }
 0x2f5   :  { %1515 = shalt.err (!%p1512_p2)
}
 0x2f6   :  { %s1516_s30 = scalar_lea.hbm %s1709_s8, 128 }
 0x2f7   :  { %p1517_p3 = scmp.ne.s32.totalorder %s1709_s8, %s1516_s30  ;;  %p1520_p4 = scmp.lt.u32.totalorder %s1516_s30, %s1709_s8 }
 0x2f9   :  { %p1522_p5 = pnand %p1520_p4, %p1517_p3 }
 0x2fb   :  { %1525 = shalt.err (!%p1522_p5)
}
 0x2fc   :  { %1092 = dma.vmem_to_hbm [thread:$0]  %s1090_s26, 128, %s1709_s8, [#allocation4]  }
 0x2fd   :  { %1532 = dma.done.wait [#allocation4], 128  }
 0x2fe   :  { %1533 = vsyncadd [#allocation4], 4294967168 }
 0x2ff   :  { %1096 = vsyncpa [#allocation3], 1 }
 0x300   :  { %1097 = vsyncpa [#allocation6], 1 }
 0x301   :  { %1098 = vsyncpa [#allocation9], 1 }
 0x302   :  { %1099 = vsyncpa [#allocation4], 1 }

</bundles_post_ra>
